<compile_context>
chip_gen: v7x
topology: tpu7x:2x2x1
jax: 0.10.0
libtpu: 0.0.40
codegen_flags: <defaults>
</compile_context>

<pallas_src>
import functools

import jax
import jax.numpy as jnp
from jax import lax
from jax.experimental import pallas as pl
from jax.experimental.pallas import tpu as pltpu


def _round_up(n, m):
    return ((n + m - 1) // m) * m


def _vmem_limit(nbytes):
    # Explicit scoped-VMEM limit: computed + headroom, clamped so it stays
    # comfortably under v7x's 64 MiB physical VMEM (fine on v5e/v6e too).
    return int(min(max(nbytes + (8 << 20), 32 << 20), 56 << 20))


# -----------------------------------------------------------------------------
# Prologue: row-normalize x and y once, fold 1/nce_t into x, emit bf16 copies
# for the MXU and the f32 diagonal scores[i, i].
# -----------------------------------------------------------------------------
def _normalize_kernel(x_ref, y_ref, xn_ref, yn_ref, diag_ref, *,
                      inv_t, valid_b, block, pad):
    i = pl.program_id(0)
    x = x_ref[...].astype(jnp.float32)            # (T, Dp)
    y = y_ref[...].astype(jnp.float32)            # (T, Dp)

    x_inv = lax.rsqrt(jnp.sum(x * x, axis=1, keepdims=True))
    y_inv = lax.rsqrt(jnp.sum(y * y, axis=1, keepdims=True))
    if pad:
        # Zero padded rows so they cannot leak into valid scores; genuinely
        # zero-norm rows still produce NaN exactly like the reference.
        r_ids = i * block + lax.broadcasted_iota(jnp.int32, (block, 1), 0)
        row_valid = r_ids < valid_b
        x_inv = jnp.where(row_valid, x_inv, 0.0)
        y_inv = jnp.where(row_valid, y_inv, 0.0)

    xn = x * (x_inv * inv_t)                      # 1/nce_t folded once (x side)
    yn = y * y_inv
    diag_ref[...] = jnp.sum(xn * yn, axis=1, keepdims=True)   # f32 scores[i,i]
    xn_ref[...] = xn.astype(jnp.bfloat16)
    yn_ref[...] = yn.astype(jnp.bfloat16)


# -----------------------------------------------------------------------------
# Main kernel: TxT score tiles, online row LSE + per-tile column LSE partials.
# -----------------------------------------------------------------------------
def _nce_lse_kernel(xn_ref, yn_ref, row_out_ref, col_out_ref, row_m, row_s, *,
                    valid_b, block, n_col_blocks, pad, resident_y):
    ri = pl.program_id(0)            # row-block index ("parallel")
    cj = pl.program_id(1)            # col-block index (row-LSE reduction axis)
    T = block

    @pl.when(cj == 0)
    def _():
        row_m[...] = jnp.full_like(row_m, -jnp.inf)
        row_s[...] = jnp.zeros_like(row_s)

    x = xn_ref[...]                                          # (T, Dp) bf16
    if resident_y:
        off = pl.multiple_of(cj * T, T)
        y = yn_ref[pl.ds(off, T), :]                         # slice resident yn
    else:
        y = yn_ref[...]                                      # streamed tile

    # scores[r, c] = <xn_r, yn_c>: bf16 operands, f32 MXU accumulate.
    s = lax.dot_general(x, y, (((1,), (1,)), ((), ())),
                        preferred_element_type=jnp.float32)  # (T, T) f32

    # ---- row logsumexp: online over column blocks (single full-tile exp) ----
    m_old = row_m[...]
    m_new = jnp.maximum(m_old, jnp.max(s, axis=1, keepdims=True))   # (T, 1)
    p = jnp.exp(s - m_new)                                          # (T, T) EUP
    if pad:
        c_ids = cj * T + lax.broadcasted_iota(jnp.int32, (1, T), 1)
        p = p * (c_ids < valid_b).astype(jnp.float32)      # drop padded columns
    row_s[...] = (row_s[...] * jnp.exp(m_old - m_new)
                  + jnp.sum(p, axis=1, keepdims=True))
    row_m[...] = m_new

    # ---- per-(row-block, col-block) column logsumexp partial -----------------
    # Reuses p: exp(s - cm) = p * exp(m_new_row) * exp(-cm_col).
    cm = jnp.max(s, axis=0, keepdims=True)                          # (1, T)
    e_row = jnp.exp(m_new)                                          # (T, 1)
    if pad:
        r_ids = ri * T + lax.broadcasted_iota(jnp.int32, (T, 1), 0)
        e_row = e_row * (r_ids < valid_b).astype(jnp.float32)  # drop padded rows
    cs = jnp.sum(p * e_row, axis=0, keepdims=True) * jnp.exp(-cm)   # (1, T)
    col_out_ref[0] = cm + jnp.log(cs)

    # ---- row finalize ---------------------------------------------------------
    @pl.when(cj == n_col_blocks - 1)
    def _():
        row_out_ref[...] = row_m[...] + jnp.log(row_s[...])


# -----------------------------------------------------------------------------
# Wrapper: mirrors NCESoftmaxLoss.forward: takes (x, _), (y, _) -> per-row [B].
# -----------------------------------------------------------------------------
def nce_softmax_loss(x_ret, y_ret, nce_t, *, block=256,
                     vmem_budget_bytes=48 * 1024 * 1024):
    x, _ = x_ret
    y, _ = y_ret
    assert x.ndim == 2 and x.shape == y.shape
    assert block % 128 == 0
    B, D = x.shape
    T = min(block, _round_up(B, 128))
    B_pad = _round_up(B, T)
    D_pad = _round_up(max(D, 128), 128)
    pad = (B_pad != B)
    if (B_pad, D_pad) != (B, D):
        x = jnp.pad(x, ((0, B_pad - B), (0, D_pad - D)))
        y = jnp.pad(y, ((0, B_pad - B), (0, D_pad - D)))
    R = B_pad // T
    C = B_pad // T
    inv_t = 1.0 / float(nce_t)

    # ---- prologue: normalize once + diagonal ---------------------------------
    norm_kernel = functools.partial(_normalize_kernel, inv_t=inv_t, valid_b=B,
                                    block=T, pad=pad)
    pro_bytes = 2 * (2 * T * D_pad * 4) + 2 * (2 * T * D_pad * 2) + 4 * T * 4
    xn, yn, diag = pl.pallas_call(
        norm_kernel,
        out_shape=(jax.ShapeDtypeStruct((B_pad, D_pad), jnp.bfloat16),
                   jax.ShapeDtypeStruct((B_pad, D_pad), jnp.bfloat16),
                   jax.ShapeDtypeStruct((B_pad, 1), jnp.float32)),
        grid_spec=pltpu.PrefetchScalarGridSpec(
            num_scalar_prefetch=0,
            grid=(R,),
            in_specs=[pl.BlockSpec((T, D_pad), lambda i: (i, 0)),
                      pl.BlockSpec((T, D_pad), lambda i: (i, 0))],
            out_specs=(pl.BlockSpec((T, D_pad), lambda i: (i, 0)),
                       pl.BlockSpec((T, D_pad), lambda i: (i, 0)),
                       pl.BlockSpec((T, 1), lambda i: (i, 0)))),
        compiler_params=pltpu.CompilerParams(
            dimension_semantics=("parallel",),
            vmem_limit_bytes=_vmem_limit(pro_bytes)),
    )(x, y)

    # ---- resident-y decision (sized against v7x's 64 MiB physical VMEM) ------
    x_bytes = 2 * T * D_pad * 2                   # double-buffered x tiles
    interm_bytes = 6 * T * T * 4 + 8 * T * 4      # scores/p/masks + accumulators
    y_resident_bytes = 2 * B_pad * D_pad * 2      # conservative: assume 2 copies
    resident_y = (y_resident_bytes + x_bytes + interm_bytes) <= vmem_budget_bytes
    if resident_y:
        y_spec = pl.BlockSpec((B_pad, D_pad), lambda ri, cj: (0, 0))
        y_bytes = y_resident_bytes
    else:
        # Streaming fallback: 3-deep pipeline hides the exposed (T, Dp) DMA.
        y_spec = pl.BlockSpec((T, D_pad), lambda ri, cj: (cj, 0),
                              pipeline_mode=pl.Buffered(3))
        y_bytes = 3 * T * D_pad * 2

    lse_kernel = functools.partial(
        _nce_lse_kernel, valid_b=B, block=T, n_col_blocks=C, pad=pad,
        resident_y=resident_y)

    row_lse, col_part = pl.pallas_call(
        lse_kernel,
        out_shape=(jax.ShapeDtypeStruct((B_pad, 1), jnp.float32),   # row LSE
                   jax.ShapeDtypeStruct((R, 1, B_pad), jnp.float32)),  # col partials
        grid_spec=pltpu.PrefetchScalarGridSpec(
            num_scalar_prefetch=0,
            grid=(R, C),
            in_specs=[pl.BlockSpec((T, D_pad), lambda ri, cj: (ri, 0)),
                      y_spec],
            out_specs=(pl.BlockSpec((T, 1), lambda ri, cj: (ri, 0)),
                       pl.BlockSpec((1, 1, T), lambda ri, cj: (ri, 0, cj))),
            scratch_shapes=[pltpu.VMEM((T, 1), jnp.float32),   # row running max
                            pltpu.VMEM((T, 1), jnp.float32)]), # row running sumexp
        compiler_params=pltpu.CompilerParams(
            # No cross-row-block state: ri may shard across TensorCores (v7x
            # megacore); only cj carries the row-LSE reduction.
            dimension_semantics=("parallel", "arbitrary"),
            vmem_limit_bytes=_vmem_limit(x_bytes + y_bytes + interm_bytes)),
    )(xn, yn)

    # Tiny cross-row-block combine + final assembly in plain JAX.
    col_lse = jax.nn.logsumexp(col_part[:, 0, :], axis=0)          # (B_pad,)
    return row_lse[:B, 0] + col_lse[:B] - 2.0 * diag[:B, 0]


def _reference(x, y, nce_t):
    xn = x / jnp.linalg.norm(x, axis=1, keepdims=True)
    yn = y / jnp.linalg.norm(y, axis=1, keepdims=True)
    scores = xn @ yn.T / nce_t
    idx = jnp.arange(x.shape[0])

    def ce(s):
        return jax.nn.logsumexp(s, axis=1) - s[idx, idx]

    return ce(scores) + ce(scores.T)


if __name__ == "__main__":
    nce_t = 0.07
    # bf16 MXU operands (f32 accumulate + f32 diagonal) -> loosened tolerance.
    ATOL, RTOL = 5e-2, 1e-2

    # Small shapes consistent with the module: batch=8, hidden=32 (grid 1x1).
    kx, ky = jax.random.split(jax.random.PRNGKey(0))
    x = jax.random.normal(kx, (8, 32), dtype=jnp.float32)
    y = jax.random.normal(ky, (8, 32), dtype=jnp.float32)
    loss = jax.block_until_ready(nce_softmax_loss((x, None), (y, None), nce_t))
    ref = _reference(x, y, nce_t)
    assert loss.shape == (8,)
    assert jnp.allclose(loss, ref, atol=ATOL, rtol=RTOL), (loss, ref)

    # Multi-block grid + padding masks + resident-y (pads 200 -> 256, grid 2x2).
    kx2, ky2 = jax.random.split(jax.random.PRNGKey(1))
    x2 = jax.random.normal(kx2, (200, 96), dtype=jnp.float32)
    y2 = jax.random.normal(ky2, (200, 96), dtype=jnp.float32)
    ref2 = _reference(x2, y2, nce_t)
    loss2 = jax.block_until_ready(
        nce_softmax_loss((x2, None), (y2, None), nce_t, block=128))
    assert jnp.allclose(loss2, ref2, atol=ATOL, rtol=RTOL), float(
        jnp.max(jnp.abs(loss2 - ref2)))

    # Same problem with the streaming-y fallback (forces vmem budget to 0).
    loss3 = jax.block_until_ready(
        nce_softmax_loss((x2, None), (y2, None), nce_t, block=128,
                         vmem_budget_bytes=0))
    assert jnp.allclose(loss3, ref2, atol=ATOL, rtol=RTOL), float(
        jnp.max(jnp.abs(loss3 - ref2)))

    print("KERNEL_OK")
</pallas_src>

<mosaic_0001>
module attributes {stable_mosaic.version = 11 : i64} {
  func.func @_normalize_kernel(%arg0: i32, %arg1: memref<128x128xf32, #tpu.memory_space<vmem>>, %arg2: memref<128x128xf32, #tpu.memory_space<vmem>>, %arg3: memref<128x128xbf16, #tpu.memory_space<vmem>>, %arg4: memref<128x128xbf16, #tpu.memory_space<vmem>>, %arg5: memref<128x1xf32, #tpu.memory_space<vmem>>) attributes {dimension_semantics = [#tpu.dimension_semantics<parallel>], iteration_bounds = array<i64: 1>, scalar_prefetch = 0 : i64, scratch_operands = 0 : i64, tpu.core_type = #tpu.core_type<tc>, window_params = [{transform_indices = @transform_0, window_bounds = array<i64: 128, 128>}, {transform_indices = @transform_1, window_bounds = array<i64: 128, 128>}, {transform_indices = @transform_2, window_bounds = array<i64: 128, 128>}, {transform_indices = @transform_3, window_bounds = array<i64: 128, 128>}, {transform_indices = @transform_4, window_bounds = array<i64: 128, 1>}]} {
    %c0 = arith.constant 0 : index
    %c0_0 = arith.constant 0 : index
    %0 = vector.load %arg1[%c0, %c0_0] : memref<128x128xf32, #tpu.memory_space<vmem>>, vector<128x128xf32>
    %c0_1 = arith.constant 0 : index
    %c0_2 = arith.constant 0 : index
    %1 = vector.load %arg2[%c0_1, %c0_2] : memref<128x128xf32, #tpu.memory_space<vmem>>, vector<128x128xf32>
    %2 = arith.mulf %0, %0 : vector<128x128xf32>
    %cst = arith.constant dense<0.000000e+00> : vector<128xf32>
    %3 = vector.multi_reduction <add>, %2, %cst [1] : vector<128x128xf32> to vector<128xf32>
    %4 = vector.shape_cast %3 : vector<128xf32> to vector<128x1xf32>
    %5 = math.rsqrt %4 : vector<128x1xf32>
    %6 = arith.mulf %1, %1 : vector<128x128xf32>
    %cst_3 = arith.constant dense<0.000000e+00> : vector<128xf32>
    %7 = vector.multi_reduction <add>, %6, %cst_3 [1] : vector<128x128xf32> to vector<128xf32>
    %8 = vector.shape_cast %7 : vector<128xf32> to vector<128x1xf32>
    %9 = math.rsqrt %8 : vector<128x1xf32>
    %c128_i32 = arith.constant 128 : i32
    %10 = arith.muli %arg0, %c128_i32 : i32
    %11 = tpu.iota {dimensions = array<i32: 0>} : vector<128x1xi32>
    %12 = vector.broadcast %10 : i32 to vector<128x1xi32>
    %13 = arith.addi %12, %11 : vector<128x1xi32>
    %c8_i32 = arith.constant 8 : i32
    %14 = vector.broadcast %c8_i32 : i32 to vector<128x1xi32>
    %15 = arith.cmpi slt, %13, %14 : vector<128x1xi32>
    %cst_4 = arith.constant 0.000000e+00 : f32
    %16 = vector.broadcast %cst_4 : f32 to vector<128x1xf32>
    %17 = arith.select %15, %5, %16 : vector<128x1xi1>, vector<128x1xf32>
    %cst_5 = arith.constant 0.000000e+00 : f32
    %18 = vector.broadcast %cst_5 : f32 to vector<128x1xf32>
    %19 = arith.select %15, %9, %18 : vector<128x1xi1>, vector<128x1xf32>
    %cst_6 = arith.constant 14.2857141 : f32
    %20 = vector.broadcast %cst_6 : f32 to vector<128x1xf32>
    %21 = arith.mulf %17, %20 : vector<128x1xf32>
    %22 = vector.broadcast %21 : vector<128x1xf32> to vector<128x128xf32>
    %23 = arith.mulf %0, %22 : vector<128x128xf32>
    %24 = vector.broadcast %19 : vector<128x1xf32> to vector<128x128xf32>
    %25 = arith.mulf %1, %24 : vector<128x128xf32>
    %26 = arith.mulf %23, %25 : vector<128x128xf32>
    %cst_7 = arith.constant dense<0.000000e+00> : vector<128xf32>
    %27 = vector.multi_reduction <add>, %26, %cst_7 [1] : vector<128x128xf32> to vector<128xf32>
    %28 = vector.shape_cast %27 : vector<128xf32> to vector<128x1xf32>
    %c0_8 = arith.constant 0 : index
    %c0_9 = arith.constant 0 : index
    %29 = vector.load %arg5[%c0_8, %c0_9] : memref<128x1xf32, #tpu.memory_space<vmem>>, vector<128x1xf32>
    tpu.vector_store %arg5[%c0_8, %c0_9], %28 {strides = array<i32>} : memref<128x1xf32, #tpu.memory_space<vmem>>, vector<128x1xf32>,
    %30 = arith.truncf %23 : vector<128x128xf32> to vector<128x128xbf16>
    %c0_10 = arith.constant 0 : index
    %c0_11 = arith.constant 0 : index
    %31 = vector.load %arg3[%c0_10, %c0_11] : memref<128x128xbf16, #tpu.memory_space<vmem>>, vector<128x128xbf16>
    tpu.vector_store %arg3[%c0_10, %c0_11], %30 {strides = array<i32>} : memref<128x128xbf16, #tpu.memory_space<vmem>>, vector<128x128xbf16>,
    %32 = arith.truncf %25 : vector<128x128xf32> to vector<128x128xbf16>
    %c0_12 = arith.constant 0 : index
    %c0_13 = arith.constant 0 : index
    %33 = vector.load %arg4[%c0_12, %c0_13] : memref<128x128xbf16, #tpu.memory_space<vmem>>, vector<128x128xbf16>
    tpu.vector_store %arg4[%c0_12, %c0_13], %32 {strides = array<i32>} : memref<128x128xbf16, #tpu.memory_space<vmem>>, vector<128x128xbf16>,
    return
  }
  func.func @transform_0(%arg0: i32) -> (i32, i32) {
    %c0_i32 = arith.constant 0 : i32
    %c0_i32_0 = arith.constant 0 : i32
    return %arg0, %c0_i32 : i32, i32
  }
  func.func @transform_1(%arg0: i32) -> (i32, i32) {
    %c0_i32 = arith.constant 0 : i32
    %c0_i32_0 = arith.constant 0 : i32
    return %arg0, %c0_i32 : i32, i32
  }
  func.func @transform_2(%arg0: i32) -> (i32, i32) {
    %c0_i32 = arith.constant 0 : i32
    %c0_i32_0 = arith.constant 0 : i32
    return %arg0, %c0_i32 : i32, i32
  }
  func.func @transform_3(%arg0: i32) -> (i32, i32) {
    %c0_i32 = arith.constant 0 : i32
    %c0_i32_0 = arith.constant 0 : i32
    return %arg0, %c0_i32 : i32, i32
  }
  func.func @transform_4(%arg0: i32) -> (i32, i32) {
    %c0_i32 = arith.constant 0 : i32
    %c0_i32_0 = arith.constant 0 : i32
    return %arg0, %c0_i32 : i32, i32
  }
}

</mosaic_0001>

<bundles_post_ra>
// kernel: tpu_custom_call.1
= control target key start
LH: loop header
LB: loop body
LE: loop exit
PB: predicated region body
PF: predicated region fallthrough
CT: control target
= control target key end

     0   :  { %10 = vsyncpa [#allocation3], 0  ;;  %s1034_s0 = inlined_call_operand.hbm [shape: f32[128,128], index: 0, kind: input, shape index: {}]   ;;  %s1035_s1 = inlined_call_operand.hbm [shape: f32[128,128], index: 1, kind: input, shape index: {}]   ;;  %s1036_s2 = inlined_call_operand.hbm [shape: bf16[128,128], index: 2, kind: output, shape index: {0}]   ;;  %s1037_s3 = inlined_call_operand.hbm [shape: bf16[128,128], index: 3, kind: output, shape index: {1}]   ;;  %s1038_s4 = inlined_call_operand.vmem [shape: f32[128,1], index: 4, kind: output, shape index: {2}]  }
   0x1   :  { %11 = vsyncpa [#allocation6], 0 }
   0x2   :  { %12 = vsyncpa [#allocation4], 0 }
   0x3   :  { %13 = vsyncpa [#allocation9], 0  ;;  %s864_s15 = smov [#allocation2]   ;;  %s768_s19 = scalar_lea.hbm %s1034_s0, 2048 }
   0x4   :  { %s19_s16 = sshll.u32 %s864_s15, 4  ;;  %p769_p0 = scmp.ne.s32.totalorder %s1034_s0, %s768_s19  ;;  %s20_s16 = int_to_ptr.vmem [resolvable:$true] %s19_s16 }
   0x5   :  { %p772_p1 = scmp.lt.u32.totalorder %s768_s19, %s1034_s0 }
   0x7   :  { %p774_p2 = pnand %p772_p1, %p769_p0 }
   0x9   :  { %777 = shalt.err (!%p774_p2)
}
   0xa   :  { %s778_s24 = scalar_lea.vmem %s20_s16, 2048  ;;  %p783_p4 = scmp.lt.s32.totalorder %s20_s16, %s20_s16 }
   0xb   :  { %p779_p3 = scmp.ne.s32.totalorder %s20_s16, %s778_s24  ;;  %p784_p5 = scmp.lt.s32.totalorder %s778_s24, %s778_s24 }
   0xd   :  { %p785_p6 = por %p784_p5, %p783_p4 }
   0xf   :  { %p786_p7 = pnand %p785_p6, %p779_p3 }
  0x11   :  { %789 = shalt.err (!%p786_p7)
}
  0x12   :  { %s865_s25 = smov 128   ;;  %s866_s26 = smov 8  }
  0x13   :  { %25 = dma.hbm_to_vmem [thread:$0]  %s1034_s0, 2048, %s20_s16, [#allocation3], %s865_s25, %s865_s25, %s866_s26  }
  0x14   :  { %s867_s29 = smov [#allocation5]   ;;  %s790_s7 = scalar_lea.hbm %s1035_s1, 2048 }
  0x15   :  { %s31_s30 = sshll.u32 %s867_s29, 4  ;;  %p791_p8 = scmp.ne.s32.totalorder %s1035_s1, %s790_s7  ;;  %s32_s30 = int_to_ptr.vmem [resolvable:$true] %s31_s30 }
  0x16   :  { %p794_p9 = scmp.lt.u32.totalorder %s790_s7, %s1035_s1 }
  0x18   :  { %p796_p10 = pnand %p794_p9, %p791_p8 }
  0x1a   :  { %799 = shalt.err (!%p796_p10)
}
  0x1b   :  { %s800_s12 = scalar_lea.vmem %s32_s30, 2048  ;;  %p805_p12 = scmp.lt.s32.totalorder %s32_s30, %s32_s30 }
  0x1c   :  { %p801_p11 = scmp.ne.s32.totalorder %s32_s30, %s800_s12  ;;  %p806_p13 = scmp.lt.s32.totalorder %s800_s12, %s800_s12 }
  0x1e   :  { %p807_p0 = por %p806_p13, %p805_p12 }
  0x20   :  { %p808_p1 = pnand %p807_p0, %p801_p11 }
  0x22   :  { %811 = shalt.err (!%p808_p1)
}
  0x23   :  { %37 = dma.hbm_to_vmem [thread:$0]  %s1035_s1, 2048, %s32_s30, [#allocation6], %s865_s25, %s865_s25, %s866_s26  }
  0x24   :  { %856 = dma.done.wait [#allocation3], 2048  }
  0x25   :  { %857 = vsyncadd [#allocation3], 4294965248 }
  0x26   :  { %858 = dma.done.wait [#allocation6], 2048  }
  0x27   :  { %859 = vsyncadd [#allocation6], 4294965248  ;;  %v921_v0 = vld [vmem:[#allocation2] sm:$0xff]  ;;  %v45_v2 = vld [vmem:[#allocation2 + $0x8] sm:$0xff]  ;;  %vm383_vm0 = vcmask 7168   ;;  %s868_s0 = smov [#allocation7]  }
  0x28   :  { %v923_v1 = vld [vmem:[#allocation5] sm:$0xff]  ;;  %v76_v3 = vmul.f32 %v921_v0, %v921_v0  ;;  %v61_v4 = vld [vmem:[#allocation5 + $0x8] sm:$0xff]  ;;  %v927_v5 = vmul.f32 0.0, %v45_v2  ;;  %v47_v6 = vld [vmem:[#allocation2 + $0x18] sm:$0xff]  ;;  %s565_s13 = sshll.u32 %s868_s0, 4  ;;  %s869_s1 = smov [#allocation8]   ;;  %s566_s13 = int_to_ptr.vmem [resolvable:$true] %s565_s13 }
  0x29   :  { %v63_v7 = vld [vmem:[#allocation5 + $0x18] sm:$0xff]  ;;  %v929_v8 = vmul.f32 0.0, %v61_v4  ;;  %v306_v9 = vmul.f32 0.0, %v47_v6  ;;  %v46_v11 = vld [vmem:[#allocation2 + $0x10] sm:$0xff]  ;;  %v140_v12 = vmul.f32 %v923_v1, %v923_v1  ;;  %v49_v13 = vld [vmem:[#allocation2 + $0x28] sm:$0xff]  ;;  %s577_s14 = sshll.u32 %s869_s1, 4  ;;  %p817_p3 = scmp.lt.s32.totalorder %s566_s13, %s566_s13  ;;  %s991_s14 = int_to_ptr.vmem [resolvable:$true] %s577_s14 }
  0x2a   :  { %v322_v10 = vmul.f32 0.0, %v63_v7  ;;  %92 = vadd.xlane.f32.xlu0 %v76_v3  ;;  %v65_v14 = vld [vmem:[#allocation5 + $0x28] sm:$0xff]  ;;  %v62_v15 = vld [vmem:[#allocation5 + $0x10] sm:$0xff]  ;;  %v305_v16 = vmul.f32 0.0, %v46_v11  ;;  %v308_v21 = vmul.f32 0.0, %v49_v13  ;;  %v51_v26 = vld [vmem:[#allocation2 + $0x38] sm:$0xff] }
  0x2b   :  { %v336_v17 = vmul.f32 %v929_v8, %v927_v5  ;;  %v321_v18 = vmul.f32 0.0, %v62_v15  ;;  %v324_v22 = vmul.f32 0.0, %v65_v14  ;;  %v67_v27 = vld [vmem:[#allocation5 + $0x38] sm:$0xff]  ;;  %v48_v28 = vld [vmem:[#allocation2 + $0x20] sm:$0xff]  ;;  %v310_v29 = vmul.f32 0.0, %v51_v26  ;;  %v53_v36 = vld [vmem:[#allocation2 + $0x48] sm:$0xff] }
  0x2c   :  { %v670_v19 = vpack.c.bf16 %v306_v9, %v305_v16  ;;  %v338_v20 = vmul.f32 %v322_v10, %v306_v9  ;;  %v326_v30 = vmul.f32 0.0, %v67_v27  ;;  %v64_v31 = vld [vmem:[#allocation5 + $0x20] sm:$0xff]  ;;  %v307_v32 = vmul.f32 0.0, %v48_v28  ;;  %v69_v37 = vld [vmem:[#allocation5 + $0x48] sm:$0xff]  ;;  %v50_v38 = vld [vmem:[#allocation2 + $0x30] sm:$0xff]  ;;  %s812_s15 = scalar_lea.vmem %s566_s13, 1024 }
  0x2d   :  { %353 = vadd.xlane.f32.xlu1 %v336_v17  ;;  %v710_v23 = vpack.c.bf16 %v322_v10, %v321_v18  ;;  %v337_v24 = vmul.f32 %v321_v18, %v305_v16  ;;  %v340_v25 = vmul.f32 %v324_v22, %v308_v21  ;;  %v323_v33 = vmul.f32 0.0, %v64_v31  ;;  %v66_v41 = vld [vmem:[#allocation5 + $0x30] sm:$0xff]  ;;  %v55_v46 = vld [vmem:[#allocation2 + $0x58] sm:$0xff]  ;;  %v52_v48 = vld [vmem:[#allocation2 + $0x40] sm:$0xff]  ;;  %p813_p2 = scmp.ne.s32.totalorder %s566_s13, %s812_s15  ;;  %p818_p4 = scmp.lt.s32.totalorder %s812_s15, %s812_s15 }
  0x2e   :  { %156 = vadd.xlane.f32.xlu0 %v140_v12  ;;  %742 = vst [vmem:[#allocation7 + $0x8] sm:$0xff] %v670_v19   ;;  %v342_v34 = vmul.f32 %v326_v30, %v310_v29  ;;  %v312_v39 = vmul.f32 0.0, %v53_v36  ;;  %v328_v40 = vmul.f32 0.0, %v69_v37  ;;  %v309_v42 = vmul.f32 0.0, %v50_v38  ;;  %v71_v47 = vld [vmem:[#allocation5 + $0x58] sm:$0xff]  ;;  %v68_v51 = vld [vmem:[#allocation5 + $0x40] sm:$0xff] }
  0x2f   :  { %749 = vst [vmem:[#allocation8 + $0x8] sm:$0xff] %v710_v23   ;;  %v339_v35 = vmul.f32 %v323_v33, %v307_v32  ;;  %v325_v43 = vmul.f32 0.0, %v66_v41  ;;  %v314_v49 = vmul.f32 0.0, %v55_v46  ;;  %v330_v50 = vmul.f32 0.0, %v71_v47  ;;  %v57_v56 = vld [vmem:[#allocation2 + $0x68] sm:$0xff]  ;;  %v54_v58 = vld [vmem:[#allocation2 + $0x50] sm:$0xff]  ;;  %p819_p5 = por %p818_p4, %p817_p3 }
  0x30   :  { %v344_v44 = vmul.f32 %v328_v40, %v312_v39  ;;  %v311_v52 = vmul.f32 0.0, %v52_v48  ;;  %v327_v53 = vmul.f32 0.0, %v68_v51  ;;  %v73_v57 = vld [vmem:[#allocation5 + $0x68] sm:$0xff]  ;;  %v675_v59 = vpack.c.bf16 %v308_v21, %v307_v32  ;;  %v70_v63 = vld [vmem:[#allocation5 + $0x50] sm:$0xff]  ;;  %v56_v2 = vld [vmem:[#allocation2 + $0x60] sm:$0xff] }
  0x31   :  { %357 = vadd.xlane.f32.xlu1 %v338_v20  ;;  %v341_v45 = vmul.f32 %v325_v43, %v309_v42  ;;  %v346_v54 = vmul.f32 %v330_v50, %v314_v49  ;;  %v715_v60 = vpack.c.bf16 %v324_v22, %v323_v33  ;;  %v680_v61 = vpack.c.bf16 %v310_v29, %v309_v42  ;;  %v72_v3 = vld [vmem:[#allocation5 + $0x60] sm:$0xff]  ;;  %v58_v21 = vld [vmem:[#allocation2 + $0x70] sm:$0xff]  ;;  %v59_v23 = vld [vmem:[#allocation2 + $0x78] sm:$0xff]  ;;  %p820_p6 = pnand %p819_p5, %p813_p2 }
  0x32   :  { %355 = vadd.xlane.f32.xlu0 %v337_v24  ;;  %v343_v55 = vmul.f32 %v327_v53, %v311_v52  ;;  %v720_v62 = vpack.c.bf16 %v326_v30, %v325_v43  ;;  %v685_v4 = vpack.c.bf16 %v312_v39, %v311_v52  ;;  %v725_v6 = vpack.c.bf16 %v328_v40, %v327_v53  ;;  %v74_v22 = vld [vmem:[#allocation5 + $0x70] sm:$0xff]  ;;  %v75_v26 = vld [vmem:[#allocation5 + $0x78] sm:$0xff] }
  0x33   :  { %v316_v7 = vmul.f32 0.0, %v57_v56  ;;  %v332_v9 = vmul.f32 0.0, %v73_v57  ;;  %743 = vst [vmem:[#allocation7 + $0x10] sm:$0xff] %v675_v59   ;;  %750 = vst [vmem:[#allocation8 + $0x10] sm:$0xff] %v715_v60   ;;  %v313_v10 = vmul.f32 0.0, %v54_v58  ;;  %v329_v11 = vmul.f32 0.0, %v70_v63 }
  0x34   :  { %744 = vst [vmem:[#allocation7 + $0x18] sm:$0xff] %v680_v61   ;;  %751 = vst [vmem:[#allocation8 + $0x18] sm:$0xff] %v720_v62   ;;  %v315_v12 = vmul.f32 0.0, %v56_v2  ;;  %v331_v13 = vmul.f32 0.0, %v72_v3  ;;  %v317_v24 = vmul.f32 0.0, %v58_v21  ;;  %v318_v27 = vmul.f32 0.0, %v59_v23 }
  0x35   :  { %361 = vadd.xlane.f32.xlu1 %v340_v25  ;;  %745 = vst [vmem:[#allocation7 + $0x20] sm:$0xff] %v685_v4   ;;  %752 = vst [vmem:[#allocation8 + $0x20] sm:$0xff] %v725_v6   ;;  %v348_v14 = vmul.f32 %v332_v9, %v316_v7  ;;  %v345_v15 = vmul.f32 %v329_v11, %v313_v10  ;;  %v690_v16 = vpack.c.bf16 %v314_v49, %v313_v10 }
  0x36   :  { %359 = vadd.xlane.f32.xlu0 %v339_v35  ;;  %v730_v17 = vpack.c.bf16 %v330_v50, %v329_v11  ;;  %v695_v18 = vpack.c.bf16 %v316_v7, %v315_v12  ;;  %v735_v19 = vpack.c.bf16 %v332_v9, %v331_v13  ;;  %v347_v20 = vmul.f32 %v331_v13, %v315_v12 }
  0x37   :  { %746 = vst [vmem:[#allocation7 + $0x28] sm:$0xff] %v690_v16   ;;  %v333_v25 = vmul.f32 0.0, %v74_v22  ;;  %v334_v28 = vmul.f32 0.0, %v75_v26  ;;  %v700_v30 = vpack.c.bf16 %v318_v27, %v317_v24 }
  0x38   :  { %753 = vst [vmem:[#allocation8 + $0x28] sm:$0xff] %v730_v17   ;;  %747 = vst [vmem:[#allocation7 + $0x30] sm:$0xff] %v695_v18  }
  0x39   :  { %365 = vadd.xlane.f32.xlu1 %v342_v34  ;;  %754 = vst [vmem:[#allocation8 + $0x30] sm:$0xff] %v735_v19   ;;  %v349_v29 = vmul.f32 %v333_v25, %v317_v24  ;;  %v350_v31 = vmul.f32 %v334_v28, %v318_v27  ;;  %v740_v32 = vpack.c.bf16 %v334_v28, %v333_v25  ;;  %748 = vst [vmem:[#allocation7 + $0x38] sm:$0xff] %v700_v30  }
  0x3a   :  { %363 = vadd.xlane.f32.xlu0 %v341_v45 }
  0x3b   :  { %755 = vst [vmem:[#allocation8 + $0x38] sm:$0xff] %v740_v32  }
  0x3d   :  { %369 = vadd.xlane.f32.xlu1 %v344_v44 }
  0x3e   :  { %367 = vadd.xlane.f32.xlu0 %v343_v55 }
  0x41   :  { %373 = vadd.xlane.f32.xlu1 %v346_v54 }
  0x42   :  { %371 = vadd.xlane.f32.xlu0 %v345_v15 }
  0x45   :  { %377 = vadd.xlane.f32.xlu1 %v348_v14 }
  0x46   :  { %375 = vadd.xlane.f32.xlu0 %v347_v20 }
  0x4a   :  { %379 = vadd.xlane.f32.xlu0 %v349_v29 }
  0xb7   :  { %v93_v33 = vpop.xlane.xlu0 %92 }
  0xb8   :  { %764 = vrsqrt.f32 %v93_v33 }
  0xba   :  { %v354_v34 = vpop.xlane.xlu1 %353 }
  0xbb   :  { %v157_v35 = vpop.xlane.xlu0 %156  ;;  %385 = vst.msk [vmem:[%s1038_s4 + $0x8] sm:$0xff] %vm383_vm0, %v354_v34 }
  0xbc   :  { %766 = vrsqrt.f32 %v157_v35 }
  0xbe   :  { %v358_v36 = vpop.xlane.xlu1 %357 }
  0xbf   :  { %387 = vst.msk [vmem:[%s1038_s4 + $0x18] sm:$0xff] %vm383_vm0, %v358_v36  ;;  %v356_v37 = vpop.xlane.xlu0 %355 }
  0xc0   :  { %386 = vst.msk [vmem:[%s1038_s4 + $0x10] sm:$0xff] %vm383_vm0, %v356_v37 }
  0xc2   :  { %v765_v38 = vpop.eup %764  ;;  %v362_v39 = vpop.xlane.xlu1 %361 }
  0xc3   :  { %v287_v40 = vmul.f32 14.285714, %v765_v38  ;;  %389 = vst.msk [vmem:[%s1038_s4 + $0x28] sm:$0xff] %vm383_vm0, %v362_v39  ;;  %v360_v48 = vpop.xlane.xlu0 %359 }
  0xc4   :  { %388 = vst.msk [vmem:[%s1038_s4 + $0x20] sm:$0xff] %vm383_vm0, %v360_v48 }
  0xc5   :  { %v303_v41 = vmul.f32 %v287_v40, %v921_v0 }
  0xc6   :  { %v767_v42 = vpop.eup %766  ;;  %v366_v45 = vpop.xlane.xlu1 %365 }
  0xc7   :  { %v319_v43 = vmul.f32 %v767_v42, %v923_v1  ;;  %v665_v44 = vpack.c.bf16 %v927_v5, %v303_v41  ;;  %391 = vst.msk [vmem:[%s1038_s4 + $0x38] sm:$0xff] %vm383_vm0, %v366_v45  ;;  %v364_v1 = vpop.xlane.xlu0 %363 }
  0xc8   :  { %390 = vst.msk [vmem:[%s1038_s4 + $0x30] sm:$0xff] %vm383_vm0, %v364_v1 }
  0xc9   :  { %v335_v46 = vmul.f32 %v319_v43, %v303_v41  ;;  %666 = vst [vmem:[#allocation7] sm:$0xff] %v665_v44   ;;  %v705_v47 = vpack.c.bf16 %v929_v8, %v319_v43 }
  0xca   :  { %v370_v0 = vpop.xlane.xlu1 %369 }
  0xcb   :  { %706 = vst [vmem:[#allocation8] sm:$0xff] %v705_v47   ;;  %351 = vadd.xlane.f32.xlu1 %v335_v46  ;;  %393 = vst.msk [vmem:[%s1038_s4 + $0x48] sm:$0xff] %vm383_vm0, %v370_v0  ;;  %v368_v8 = vpop.xlane.xlu0 %367 }
  0xcc   :  { %392 = vst.msk [vmem:[%s1038_s4 + $0x40] sm:$0xff] %vm383_vm0, %v368_v8 }
  0xce   :  { %v374_v5 = vpop.xlane.xlu1 %373 }
  0xcf   :  { %381 = vadd.xlane.f32.xlu1 %v350_v31  ;;  %395 = vst.msk [vmem:[%s1038_s4 + $0x58] sm:$0xff] %vm383_vm0, %v374_v5  ;;  %v372_v50 = vpop.xlane.xlu0 %371 }
  0xd0   :  { %394 = vst.msk [vmem:[%s1038_s4 + $0x50] sm:$0xff] %vm383_vm0, %v372_v50 }
  0xd2   :  { %v378_v49 = vpop.xlane.xlu1 %377 }
  0xd3   :  { %397 = vst.msk [vmem:[%s1038_s4 + $0x68] sm:$0xff] %vm383_vm0, %v378_v49  ;;  %v376_v51 = vpop.xlane.xlu0 %375 }
  0xd4   :  { %396 = vst.msk [vmem:[%s1038_s4 + $0x60] sm:$0xff] %vm383_vm0, %v376_v51 }
  0xd7   :  { %v380_v52 = vpop.xlane.xlu0 %379 }
  0xd8   :  { %823 = shalt.err (!%p820_p6)
}
  0xd9   :  { %s824_s18 = scalar_lea.hbm %s1036_s2, 1024 }
  0xda   :  { %p825_p7 = scmp.ne.s32.totalorder %s1036_s2, %s824_s18  ;;  %p828_p8 = scmp.lt.u32.totalorder %s824_s18, %s1036_s2 }
  0xdc   :  { %p830_p9 = pnand %p828_p8, %p825_p7 }
  0xde   :  { %833 = shalt.err (!%p830_p9)
}
  0xdf   :  { %s870_s23 = smov 64   ;;  %s871_s24 = smov 4   ;;  %398 = vst.msk [vmem:[%s1038_s4 + $0x70] sm:$0xff] %vm383_vm0, %v380_v52 }
  0xe0   :  { %571 = dma.vmem_to_hbm [thread:$0]  %s566_s13, 1024, %s1036_s2, [#allocation4], %s870_s23, %s870_s23, %s871_s24  }
  0xe1   :  { %s834_s29 = scalar_lea.vmem %s991_s14, 1024  ;;  %p839_p11 = scmp.lt.s32.totalorder %s991_s14, %s991_s14 }
  0xe2   :  { %p835_p10 = scmp.ne.s32.totalorder %s991_s14, %s834_s29  ;;  %p840_p12 = scmp.lt.s32.totalorder %s834_s29, %s834_s29 }
  0xe4   :  { %p841_p13 = por %p840_p12, %p839_p11 }
  0xe6   :  { %p842_p0 = pnand %p841_p13, %p835_p10 }
  0xe8   :  { %845 = shalt.err (!%p842_p0)
}
  0xe9   :  { %s846_s6 = scalar_lea.hbm %s1037_s3, 1024 }
  0xea   :  { %p847_p1 = scmp.ne.s32.totalorder %s1037_s3, %s846_s6  ;;  %p850_p2 = scmp.lt.u32.totalorder %s846_s6, %s1037_s3 }
  0xec   :  { %p852_p3 = pnand %p850_p2, %p847_p1 }
  0xee   :  { %855 = shalt.err (!%p852_p3)
}
  0xef   :  { %583 = dma.vmem_to_hbm [thread:$0]  %s991_s14, 1024, %s1037_s3, [#allocation9], %s870_s23, %s870_s23, %s871_s24  }
 0x158   :  { %v352_v53 = vpop.xlane.xlu1 %351 }
 0x159   :  { %384 = vst.msk [vmem:[%s1038_s4] sm:$0xff] %vm383_vm0, %v352_v53 }
 0x15c   :  { %v382_v54 = vpop.xlane.xlu1 %381 }
 0x15d   :  { %399 = vst.msk [vmem:[%s1038_s4 + $0x78] sm:$0xff] %vm383_vm0, %v382_v54 }
 0x15e   :  { %860 = dma.done.wait [#allocation4], 1024  }
 0x15f   :  { %861 = vsyncadd [#allocation4], 4294966272 }
 0x160   :  { %862 = dma.done.wait [#allocation9], 1024  }
 0x161   :  { %863 = vsyncadd [#allocation9], 4294966272 }
 0x162   :  { %594 = vsyncpa [#allocation3], 1 }
 0x163   :  { %595 = vsyncpa [#allocation6], 1 }
 0x164   :  { %596 = vsyncpa [#allocation4], 1 }
 0x165   :  { %597 = vsyncpa [#allocation9], 1 }

</bundles_post_ra>
